<compile_context>
chip_gen: v7x
topology: tpu7x:2x2x1
jax: 0.10.0
libtpu: 0.0.40
codegen_flags: <defaults>
</compile_context>

<pallas_src>
import functools

import jax
import jax.numpy as jnp
from jax.experimental import pallas as pl
from jax.experimental.pallas import tpu as pltpu


KAPPA = 1.0  # deterministic UCB exploration weight (compile-time constant)


def _neg_ucb_kernel(mean_ref, std_ref, out_ref, *, kappa: float):
    """Elementwise negated acquisition score: out = -(mean + kappa*std) (VPU).

    The negation is fused here so the wrapper can rank with a plain ascending
    argsort, avoiding an extra full HBM round-trip over the scores.
    """
    m = mean_ref[...]
    s = std_ref[...]
    if kappa == 1.0:
        out_ref[...] = -(m + s)
    else:
        out_ref[...] = -(m + kappa * s)


def neg_ucb_scores(mean: jax.Array, stddev: jax.Array, kappa: float) -> jax.Array:
    """Compute negated acquisition scores with a Pallas TPU kernel.

    mean, stddev: float32 arrays of shape (R, 128).
    Returns float32 array of shape (R, 128) holding -(mean + kappa*stddev).
    """
    assert mean.shape == stddev.shape
    assert mean.ndim == 2
    R, L = mean.shape

    # Tile rows: ~512 rows/tile (256 KiB per f32 buffer) keeps
    # 2 inputs + 1 output x 2 pipeline buffers well under VMEM limits on
    # every generation (incl. v7x's 32 MiB default scoped VMEM) while being
    # large enough to hit near-roofline HBM streaming.  For small R, one
    # full-extent block is used (block == full array dims is always legal).
    tile_r = R if R <= 512 else 512
    grid = (pl.cdiv(R, tile_r),)

    return pl.pallas_call(
        functools.partial(_neg_ucb_kernel, kappa=kappa),
        out_shape=jax.ShapeDtypeStruct((R, L), jnp.float32),
        grid=grid,
        in_specs=[
            pl.BlockSpec((tile_r, L), lambda i: (i, 0)),
            pl.BlockSpec((tile_r, L), lambda i: (i, 0)),
        ],
        out_specs=pl.BlockSpec((tile_r, L), lambda i: (i, 0)),
        compiler_params=pltpu.CompilerParams(
            # "parallel": independent tiles -> shardable across the two
            # TensorCores on v7x; neutral on single-TC v5e/v6e.
            dimension_semantics=("parallel",),
        ),
    )(mean, stddev)


def policy_forward(mean: jax.Array, stddev: jax.Array) -> jax.Array:
    """Concrete `Policy.forward`: rank candidate indices by UCB acquisition.

    Parameters
    ----------
    mean, stddev : (R, 128) float32 — parameters of the (Normal) predictive
        distribution over N = R*128 candidate points.

    Returns
    -------
    (N,) int32 — indices sorted by descending acquisition score.
    """
    neg_scores = neg_ucb_scores(mean, stddev, KAPPA)   # Pallas hot path
    flat = neg_scores.reshape(-1)
    # Ascending argsort of the negated scores == descending rank of scores.
    # TODO(synk): full argsort (ranking) has no clean Pallas TPU primitive;
    # done in XLA.  If only the top-k acquisitions are needed, replace with
    # jax.lax.top_k(-flat, k) for an O(N) streaming pass.
    ranked = jnp.argsort(flat).astype(jnp.int32)
    return ranked


if __name__ == "__main__":
    key = jax.random.PRNGKey(0)
    k_mean, k_std = jax.random.split(key)

    R, L = 8, 128  # N = 1024 candidate points
    mean = jax.random.normal(k_mean, (R, L), dtype=jnp.float32)
    stddev = jax.nn.softplus(jax.random.normal(k_std, (R, L), dtype=jnp.float32))

    ranked = policy_forward(mean, stddev)
    ranked = jax.block_until_ready(ranked)

    # sanity: ranked indices must be a permutation and scores must be sorted desc
    ref_scores = (mean + KAPPA * stddev).reshape(-1)
    assert ranked.shape == (R * L,)
    assert int(jnp.unique(ranked).shape[0]) == R * L
    sorted_scores = ref_scores[ranked]
    assert bool(jnp.all(sorted_scores[:-1] >= sorted_scores[1:]))

    print("KERNEL_OK")
</pallas_src>

<mosaic_0001>
module attributes {stable_mosaic.version = 11 : i64} {
  func.func @_neg_ucb_kernel(%arg0: i32, %arg1: memref<8x128xf32, #tpu.memory_space<vmem>>, %arg2: memref<8x128xf32, #tpu.memory_space<vmem>>, %arg3: memref<8x128xf32, #tpu.memory_space<vmem>>) attributes {dimension_semantics = [#tpu.dimension_semantics<parallel>], iteration_bounds = array<i64: 1>, scalar_prefetch = 0 : i64, scratch_operands = 0 : i64, tpu.core_type = #tpu.core_type<tc>, window_params = [{transform_indices = @transform_0, window_bounds = array<i64: 8, 128>}, {transform_indices = @transform_1, window_bounds = array<i64: 8, 128>}, {transform_indices = @transform_2, window_bounds = array<i64: 8, 128>}]} {
    %c0 = arith.constant 0 : index
    %c0_0 = arith.constant 0 : index
    %0 = vector.load %arg1[%c0, %c0_0] : memref<8x128xf32, #tpu.memory_space<vmem>>, vector<8x128xf32>
    %c0_1 = arith.constant 0 : index
    %c0_2 = arith.constant 0 : index
    %1 = vector.load %arg2[%c0_1, %c0_2] : memref<8x128xf32, #tpu.memory_space<vmem>>, vector<8x128xf32>
    %2 = arith.addf %0, %1 : vector<8x128xf32>
    %cst = arith.constant 0.000000e+00 : f32
    %3 = vector.broadcast %cst : f32 to vector<8x128xf32>
    %4 = arith.subf %3, %2 : vector<8x128xf32>
    %c0_3 = arith.constant 0 : index
    %c0_4 = arith.constant 0 : index
    %5 = vector.load %arg3[%c0_3, %c0_4] : memref<8x128xf32, #tpu.memory_space<vmem>>, vector<8x128xf32>
    tpu.vector_store %arg3[%c0_3, %c0_4], %4 {strides = array<i32>} : memref<8x128xf32, #tpu.memory_space<vmem>>, vector<8x128xf32>,
    return
  }
  func.func @transform_0(%arg0: i32) -> (i32, i32) {
    %c0_i32 = arith.constant 0 : i32
    %c0_i32_0 = arith.constant 0 : i32
    return %arg0, %c0_i32 : i32, i32
  }
  func.func @transform_1(%arg0: i32) -> (i32, i32) {
    %c0_i32 = arith.constant 0 : i32
    %c0_i32_0 = arith.constant 0 : i32
    return %arg0, %c0_i32 : i32, i32
  }
  func.func @transform_2(%arg0: i32) -> (i32, i32) {
    %c0_i32 = arith.constant 0 : i32
    %c0_i32_0 = arith.constant 0 : i32
    return %arg0, %c0_i32 : i32, i32
  }
}

</mosaic_0001>

<bundles_post_ra>
// kernel: tpu_custom_call.1
= control target key start
LH: loop header
LB: loop body
LE: loop exit
PB: predicated region body
PF: predicated region fallthrough
CT: control target
= control target key end

     0   :  { %7 = vsyncpa [#allocation3], 0  ;;  %s186_s0 = inlined_call_operand.hbm [shape: f32[8,128], index: 0, kind: input, shape index: {}]   ;;  %s187_s1 = inlined_call_operand.hbm [shape: f32[8,128], index: 1, kind: input, shape index: {}]   ;;  %s188_s2 = inlined_call_operand.hbm [shape: f32[8,128], index: 2, kind: output, shape index: {}]  }
   0x1   :  { %8 = vsyncpa [#allocation6], 0 }
   0x2   :  { %9 = vsyncpa [#allocation4], 0  ;;  %s132_s9 = smov [#allocation2]   ;;  %s133_s11 = smov [#allocation5]  }
   0x3   :  { %s16_s10 = sshll.u32 %s132_s9, 4  ;;  %s26_s12 = sshll.u32 %s133_s11, 4  ;;  %s17_s10 = int_to_ptr.vmem [resolvable:$true] %s16_s10  ;;  %s27_s12 = int_to_ptr.vmem [resolvable:$true] %s26_s12 }
   0x4   :  { %s60_s15 = scalar_lea.hbm %s186_s0, 128 }
   0x5   :  { %p61_p0 = scmp.ne.s32.totalorder %s186_s0, %s60_s15  ;;  %p64_p1 = scmp.lt.u32.totalorder %s60_s15, %s186_s0 }
   0x7   :  { %p66_p2 = pnand %p64_p1, %p61_p0 }
   0x9   :  { %69 = shalt.err (!%p66_p2)
}
   0xa   :  { %s70_s20 = scalar_lea.vmem %s17_s10, 128  ;;  %p75_p4 = scmp.lt.s32.totalorder %s17_s10, %s17_s10 }
   0xb   :  { %p71_p3 = scmp.ne.s32.totalorder %s17_s10, %s70_s20  ;;  %p76_p5 = scmp.lt.s32.totalorder %s70_s20, %s70_s20 }
   0xd   :  { %p77_p6 = por %p76_p5, %p75_p4 }
   0xf   :  { %p78_p7 = pnand %p77_p6, %p71_p3 }
  0x11   :  { %81 = shalt.err (!%p78_p7)
}
  0x12   :  { %19 = dma.hbm_to_vmem [thread:$0]  %s186_s0, 128, %s17_s10, [#allocation3]  }
  0x13   :  { %s82_s25 = scalar_lea.hbm %s187_s1, 128 }
  0x14   :  { %p83_p8 = scmp.ne.s32.totalorder %s187_s1, %s82_s25  ;;  %p86_p9 = scmp.lt.u32.totalorder %s82_s25, %s187_s1 }
  0x16   :  { %p88_p10 = pnand %p86_p9, %p83_p8 }
  0x18   :  { %91 = shalt.err (!%p88_p10)
}
  0x19   :  { %s92_s30 = scalar_lea.vmem %s27_s12, 128  ;;  %p97_p12 = scmp.lt.s32.totalorder %s27_s12, %s27_s12 }
  0x1a   :  { %p93_p11 = scmp.ne.s32.totalorder %s27_s12, %s92_s30  ;;  %p98_p13 = scmp.lt.s32.totalorder %s92_s30, %s92_s30 }
  0x1c   :  { %p99_p0 = por %p98_p13, %p97_p12 }
  0x1e   :  { %p100_p1 = pnand %p99_p0, %p93_p11 }
  0x20   :  { %103 = shalt.err (!%p100_p1)
}
  0x21   :  { %29 = dma.hbm_to_vmem [thread:$0]  %s187_s1, 128, %s27_s12, [#allocation6]  }
  0x22   :  { %126 = dma.done.wait [#allocation3], 128  }
  0x23   :  { %127 = vsyncadd [#allocation3], 4294967168 }
  0x24   :  { %128 = dma.done.wait [#allocation6], 128  }
  0x25   :  { %129 = vsyncadd [#allocation6], 4294967168  ;;  %v36_v0 = vld [vmem:[#allocation2] sm:$0xff]  ;;  %v37_v1 = vld [vmem:[#allocation5] sm:$0xff]  ;;  %s134_s4 = smov [#allocation7]  }
  0x26   :  { %s47_s5 = sshll.u32 %s134_s4, 4  ;;  %v38_v2 = vadd.f32 %v37_v1, %v36_v0  ;;  %s48_s5 = int_to_ptr.vmem [resolvable:$true] %s47_s5 }
  0x27   :  { %s104_s6 = scalar_lea.vmem %s48_s5, 128  ;;  %p109_p3 = scmp.lt.s32.totalorder %s48_s5, %s48_s5 }
  0x28   :  { %v39_v3 = vsub.f32 0.0, %v38_v2  ;;  %p105_p2 = scmp.ne.s32.totalorder %s48_s5, %s104_s6  ;;  %p110_p4 = scmp.lt.s32.totalorder %s104_s6, %s104_s6 }
  0x2a   :  { %40 = vst [vmem:[#allocation7] sm:$0xff] %v39_v3  ;;  %p111_p5 = por %p110_p4, %p109_p3 }
  0x2c   :  { %p112_p6 = pnand %p111_p5, %p105_p2 }
  0x2e   :  { %115 = shalt.err (!%p112_p6)
}
  0x2f   :  { %s116_s8 = scalar_lea.hbm %s188_s2, 128 }
  0x30   :  { %p117_p7 = scmp.ne.s32.totalorder %s188_s2, %s116_s8  ;;  %p120_p8 = scmp.lt.u32.totalorder %s116_s8, %s188_s2 }
  0x32   :  { %p122_p9 = pnand %p120_p8, %p117_p7 }
  0x34   :  { %125 = shalt.err (!%p122_p9)
}
  0x35   :  { %50 = dma.vmem_to_hbm [thread:$0]  %s48_s5, 128, %s188_s2, [#allocation4]  }
  0x36   :  { %130 = dma.done.wait [#allocation4], 128  }
  0x37   :  { %131 = vsyncadd [#allocation4], 4294967168 }
  0x38   :  { %54 = vsyncpa [#allocation3], 1 }
  0x39   :  { %55 = vsyncpa [#allocation6], 1 }
  0x3a   :  { %56 = vsyncpa [#allocation4], 1 }

</bundles_post_ra>
